<compile_context>
chip_gen: v5e
topology: v5e:2x2
jax: 0.10.0
libtpu: 0.0.40
codegen_flags: <defaults>
</compile_context>

<pallas_src>
import jax
import jax.numpy as jnp
from jax.experimental import pallas as pl
from jax.experimental.pallas import tpu as pltpu


def _anomaly_l1_kernel(p_ref, m_ref, vq_ref, out_ref):
    # Grid: (N, V).  The (1, 1) output block is indexed by n only, so it stays resident in
    # VMEM across the V ("arbitrary") axis and serves as the per-sample accumulator.
    @pl.when(pl.program_id(1) == 0)
    def _():
        out_ref[...] = jnp.zeros_like(out_ref)

    x = p_ref[...].astype(jnp.float32)           # (C*T, H*W)  lane-dense pred slab
    w = 1.0 - m_ref[...].astype(jnp.float32)     # (1,   H*W)  broadcast over rows (C*T)
    vq = vq_ref[...].astype(jnp.float32)         # (C*T, 1)    broadcast over lanes (H*W)

    contrib = jnp.abs(x - vq) * w                # pure VPU elementwise work
    out_ref[...] += jnp.sum(contrib)             # one block-wide reduce per grid step


def anomaly_l1_loss_synthetic(pred, mask_extreme, vq_0):
    """pred: (N, V, C, T, H, W); mask_extreme: (N, H, W); vq_0: (N, C)  ->  scalar loss."""
    N, V, C, T, H, W = pred.shape
    HW = H * W
    CT = C * T

    # Free (metadata-only) reshapes of contiguous dims -- no extra HBM pass over pred.
    pred_r = pred.reshape(N, V, CT, HW)
    mask_r = mask_extreme.reshape(N, 1, HW)
    # vq_0[n, c] repeated along T so its row index matches pred's (c*T + t) rows. Tiny (N*C*T).
    vq_r = jnp.broadcast_to(vq_0.astype(jnp.float32)[:, :, None], (N, C, T)).reshape(N, CT, 1)

    partial = pl.pallas_call(
        _anomaly_l1_kernel,
        out_shape=jax.ShapeDtypeStruct((N, 1, 1), jnp.float32),
        grid_spec=pltpu.PrefetchScalarGridSpec(
            num_scalar_prefetch=0,
            grid=(N, V),
            in_specs=[
                # one full (C*T, H*W) slab of pred per grid step (~192 KiB for default dims)
                pl.BlockSpec((None, None, CT, HW), lambda n, v: (n, v, 0, 0)),
                # tiny broadcast side inputs (constant along the V axis)
                pl.BlockSpec((None, 1, HW), lambda n, v: (n, 0, 0)),
                pl.BlockSpec((None, CT, 1), lambda n, v: (n, 0, 0)),
            ],
            out_specs=pl.BlockSpec((None, 1, 1), lambda n, v: (n, 0, 0)),
        ),
        compiler_params=pltpu.CompilerParams(
            # N parallel -> megacore split on v7x; V is the resident-accumulator reduction axis.
            dimension_semantics=("parallel", "arbitrary")),
    )(pred_r, mask_r, vq_r)

    # sum(weights) == V*C*T * sum(1 - mask); mask is tiny (N*H*W), so finish on scalars here.
    denom = jnp.float32(V * C * T) * jnp.sum(1.0 - mask_extreme.astype(jnp.float32))
    return jnp.sum(partial) / denom


def _reference_loss(pred, mask_extreme, vq_0):
    """Pure-JAX reference mirroring the PyTorch module's forward."""
    N, V, C, T, H, W = pred.shape
    mask_b = jnp.broadcast_to(
        mask_extreme[:, None, None, None, :, :].astype(jnp.float32), pred.shape)
    weights = 1.0 - mask_b
    vq_b = jnp.broadcast_to(
        vq_0[:, None, :, None, None, None].astype(jnp.float32), pred.shape)
    target = jnp.where(mask_b == 1.0, pred.astype(jnp.float32), vq_b)
    loss_el = jnp.abs(pred.astype(jnp.float32) - target)
    return jnp.sum(loss_el * weights) / jnp.sum(weights)


if __name__ == "__main__":
    key = jax.random.PRNGKey(0)
    k1, k2, k3 = jax.random.split(key, 3)

    # Module defaults: n_dynamic=3, dim=24, delta_t=8; small batch/spatial.
    N, V, C, T, H, W = 2, 3, 24, 8, 16, 16
    pred = jax.random.normal(k1, (N, V, C, T, H, W), dtype=jnp.float32)
    mask_extreme = (jax.random.uniform(k2, (N, H, W)) > 0.8).astype(jnp.float32)
    vq_0 = jax.random.normal(k3, (N, C), dtype=jnp.float32)

    loss = jax.jit(anomaly_l1_loss_synthetic)(pred, mask_extreme, vq_0)
    jax.block_until_ready(loss)

    ref = _reference_loss(pred, mask_extreme, vq_0)
    assert jnp.allclose(loss, ref, rtol=5e-5, atol=1e-5), (loss, ref)

    print("KERNEL_OK")
</pallas_src>

<mosaic_0001>
module attributes {stable_mosaic.version = 11 : i64} {
  func.func @_anomaly_l1_kernel(%arg0: i32, %arg1: i32, %arg2: memref<1x1x192x256xf32, #tpu.memory_space<vmem>>, %arg3: memref<1x1x256xf32, #tpu.memory_space<vmem>>, %arg4: memref<1x192x1xf32, #tpu.memory_space<vmem>>, %arg5: memref<1x1x1xf32, #tpu.memory_space<vmem>>) attributes {dimension_semantics = [#tpu.dimension_semantics<parallel>, #tpu.dimension_semantics<arbitrary>], iteration_bounds = array<i64: 2, 3>, scalar_prefetch = 0 : i64, scratch_operands = 0 : i64, tpu.core_type = #tpu.core_type<tc>, window_params = [{transform_indices = @transform_0, window_bounds = array<i64: 1, 1, 192, 256>}, {transform_indices = @transform_1, window_bounds = array<i64: 1, 1, 256>}, {transform_indices = @transform_2, window_bounds = array<i64: 1, 192, 1>}, {transform_indices = @transform_3, window_bounds = array<i64: 1, 1, 1>}]} {
    %c0_i32 = arith.constant 0 : i32
    %0 = arith.cmpi eq, %arg1, %c0_i32 : i32
    %1 = arith.extui %0 : i1 to i32
    %c0_i32_0 = arith.constant 0 : i32
    %2 = arith.cmpi ne, %1, %c0_i32_0 : i32
    scf.if %2 {
      %cst_17 = arith.constant 0.000000e+00 : f32
      %27 = vector.broadcast %cst_17 : f32 to vector<1x1xf32>
      %c0_18 = arith.constant 0 : index
      %c0_19 = arith.constant 0 : index
      %c0_20 = arith.constant 0 : index
      %28 = vector.load %arg5[%c0_18, %c0_19, %c0_20] : memref<1x1x1xf32, #tpu.memory_space<vmem>>, vector<1x1x1xf32>
      %29 = vector.shape_cast %28 : vector<1x1x1xf32> to vector<1x1xf32>
      %30 = vector.shape_cast %27 : vector<1x1xf32> to vector<1x1x1xf32>
      tpu.vector_store %arg5[%c0_18, %c0_19, %c0_20], %30 {strides = array<i32>} : memref<1x1x1xf32, #tpu.memory_space<vmem>>, vector<1x1x1xf32>,
    } else {
    }
    %c0 = arith.constant 0 : index
    %c0_1 = arith.constant 0 : index
    %c0_2 = arith.constant 0 : index
    %c0_3 = arith.constant 0 : index
    %3 = vector.load %arg2[%c0, %c0_1, %c0_2, %c0_3] : memref<1x1x192x256xf32, #tpu.memory_space<vmem>>, vector<1x1x192x256xf32>
    %4 = vector.shape_cast %3 : vector<1x1x192x256xf32> to vector<192x256xf32>
    %c0_4 = arith.constant 0 : index
    %c0_5 = arith.constant 0 : index
    %c0_6 = arith.constant 0 : index
    %5 = vector.load %arg3[%c0_4, %c0_5, %c0_6] : memref<1x1x256xf32, #tpu.memory_space<vmem>>, vector<1x1x256xf32>
    %6 = vector.shape_cast %5 : vector<1x1x256xf32> to vector<1x256xf32>
    %cst = arith.constant 1.000000e+00 : f32
    %7 = vector.broadcast %cst : f32 to vector<1x256xf32>
    %8 = arith.subf %7, %6 : vector<1x256xf32>
    %c0_7 = arith.constant 0 : index
    %c0_8 = arith.constant 0 : index
    %c0_9 = arith.constant 0 : index
    %9 = vector.load %arg4[%c0_7, %c0_8, %c0_9] : memref<1x192x1xf32, #tpu.memory_space<vmem>>, vector<1x192x1xf32>
    %10 = vector.shape_cast %9 : vector<1x192x1xf32> to vector<192x1xf32>
    %11 = vector.broadcast %10 : vector<192x1xf32> to vector<192x256xf32>
    %12 = arith.subf %4, %11 : vector<192x256xf32>
    %13 = math.absf %12 : vector<192x256xf32>
    %14 = vector.broadcast %8 : vector<1x256xf32> to vector<192x256xf32>
    %15 = arith.mulf %13, %14 : vector<192x256xf32>
    %c0_10 = arith.constant 0 : index
    %c0_11 = arith.constant 0 : index
    %c0_12 = arith.constant 0 : index
    %16 = vector.load %arg5[%c0_10, %c0_11, %c0_12] : memref<1x1x1xf32, #tpu.memory_space<vmem>>, vector<1x1x1xf32>
    %17 = vector.shape_cast %16 : vector<1x1x1xf32> to vector<1x1xf32>
    %18 = vector.shape_cast %15 : vector<192x256xf32> to vector<1x192x256xf32>
    %cst_13 = arith.constant dense<0.000000e+00> : vector<1xf32>
    %19 = vector.multi_reduction <add>, %18, %cst_13 [1, 2] : vector<1x192x256xf32> to vector<1xf32>
    %20 = vector.shape_cast %19 : vector<1xf32> to vector<1x1x1xf32>
    %21 = vector.extract %20[0, 0, 0] : f32 from vector<1x1x1xf32>
    %22 = vector.broadcast %21 : f32 to vector<1x1xf32>
    %23 = arith.addf %17, %22 : vector<1x1xf32>
    %c0_14 = arith.constant 0 : index
    %c0_15 = arith.constant 0 : index
    %c0_16 = arith.constant 0 : index
    %24 = vector.load %arg5[%c0_14, %c0_15, %c0_16] : memref<1x1x1xf32, #tpu.memory_space<vmem>>, vector<1x1x1xf32>
    %25 = vector.shape_cast %24 : vector<1x1x1xf32> to vector<1x1xf32>
    %26 = vector.shape_cast %23 : vector<1x1xf32> to vector<1x1x1xf32>
    tpu.vector_store %arg5[%c0_14, %c0_15, %c0_16], %26 {strides = array<i32>} : memref<1x1x1xf32, #tpu.memory_space<vmem>>, vector<1x1x1xf32>,
    return
  }
  func.func @transform_0(%arg0: i32, %arg1: i32) -> (i32, i32, i32, i32) {
    %c0_i32 = arith.constant 0 : i32
    %c0_i32_0 = arith.constant 0 : i32
    %c0_i32_1 = arith.constant 0 : i32
    return %arg0, %arg1, %c0_i32, %c0_i32_0 : i32, i32, i32, i32
  }
  func.func @transform_1(%arg0: i32, %arg1: i32) -> (i32, i32, i32) {
    %c0_i32 = arith.constant 0 : i32
    %c0_i32_0 = arith.constant 0 : i32
    %c0_i32_1 = arith.constant 0 : i32
    return %arg0, %c0_i32, %c0_i32_0 : i32, i32, i32
  }
  func.func @transform_2(%arg0: i32, %arg1: i32) -> (i32, i32, i32) {
    %c0_i32 = arith.constant 0 : i32
    %c0_i32_0 = arith.constant 0 : i32
    %c0_i32_1 = arith.constant 0 : i32
    return %arg0, %c0_i32, %c0_i32_0 : i32, i32, i32
  }
  func.func @transform_3(%arg0: i32, %arg1: i32) -> (i32, i32, i32) {
    %c0_i32 = arith.constant 0 : i32
    %c0_i32_0 = arith.constant 0 : i32
    %c0_i32_1 = arith.constant 0 : i32
    return %arg0, %c0_i32, %c0_i32_0 : i32, i32, i32
  }
}

</mosaic_0001>

<bundles_post_ra>
// kernel: anomaly_l1_loss_synthetic.1
= control target key start
LH: loop header
LB: loop body
LE: loop exit
PB: predicated region body
PF: predicated region fallthrough
CT: control target
= control target key end

     0   :  { %s854_s12 = smov 0   ;;  %s856_s13 = smov 0   ;;  %s1052_s0 = inlined_call_operand.vmem [shape: f32[2,3,192,256], index: 0, kind: input, shape index: {}]   ;;  %s1053_s1 = inlined_call_operand.vmem [shape: f32[2,1,256], index: 1, kind: input, shape index: {}]   ;;  %s1054_s2 = inlined_call_operand.vmem [shape: f32[2,192,1], index: 2, kind: input, shape index: {}]   ;;  %s1055_s3 = inlined_call_operand.vmem [shape: f32[2,1,1], index: 3, kind: output, shape index: {}]  }
   0x1   :  { %s858_s14 = smov 0   ;;  %s860_s15 = smov 0  }
   0x2   :  { %s862_s16 = smov 0  }
   0x3 LB: > { %s22_s17 = sadd.s32 1, %s822_s14  ;;  %s25_s18 = sadd.s32 1, %s826_s15  ;;  %s830_s16 = sphi %s862_s16, %s13_s16   ;;  %s826_s15 = sphi %s860_s15, %s1059_s15   ;;  %s822_s14 = sphi %s858_s14, %s1058_s14   ;;  %s818_s13 = sphi %s856_s13, %s1057_s13   ;;  %s814_s12 = sphi %s854_s12, %s1056_s12  }
   0x4   : > { %p23_p0 = scmp.ge.s32.totalorder %s22_s17, 3  ;;  %p735_p1 = scmp.ge.s32.totalorder %s830_s16, 1 }
   0x5   : > { %p174_p2 = scmp.lt.s32.totalorder %s830_s16, 7 }
   0x6   : > { %s1061_s17 = smov (%p23_p0, %s22_s17), 0  ;;  %s1063_s18 = smov (!%p23_p0, %s25_s18), %s826_s15 }
   0x7   : > { %p175_p3 = pnand %p735_p1, %p174_p2  ;;  %p27_p4 = scmp.ge.s32.totalorder %s1063_s18, 2 }
   0x8   : > { %p209_p5 = scmp.lt.s32.totalorder (!%p175_p3), %s818_s13, 1  ;;  %p211_p6 = scmp.lt.s32.totalorder (!%p175_p3), %s814_s12, 2 }
   0x9   : > { %s1065_s18 = smov (%p27_p4, %s1063_s18), 0  ;;  %178 = sbr.rel (%p175_p3) target bundleno = 432 (0x1b0), region = 32 }
   0xa   : > { %p739_p7 = scmp.ne.s32.totalorder (!%p175_p3), %s814_s12, 0 }
   0xe   : > { %s1067_s13 = smov (!%p209_p5, %s818_s13), 1 }
   0xf   : > { %s212_s19 = scalar_select %p211_p6, %s814_s12, 2 }
  0x10   : > { %s743_s20 = smul.u32 144, %s1067_s13  ;;  %s737_s21 = sshll.u32 %s1067_s13, 1 }
  0x11   : > { %s742_s22 = smul.u32 48, %s212_s19  ;;  %s891_s25 = scalar_lea.vmem %s1053_s1, %s737_s21 }
  0x12   : > { %s744_s26 = smul.u32 192, %s1067_s13  ;;  %s896_s29 = scalar_lea.vmem %s1055_s3, %s1067_s13 }
  0x13   : > { %s215_s30 = sadd.s32 %s743_s20, %s742_s22  ;;  %233 = sbr.rel (%p739_p7) target bundleno = 26 (0x1a), region = 36 }
  0x14   : > { %s736_s4 = sshll.u32 %s215_s30, 3  ;;  %s901_s7 = scalar_lea.vmem %s1054_s2, %s744_s26 }
  0x15   : > { %s906_s10 = scalar_lea.vmem %s1052_s0, %s736_s4 }
  0x18   : > { %vm234_vm0 = vcmask 0   ;;  %v832_v0 = vmov 0.0  }
  0x19   : > { %235 = vst.msk [vmem:[%s896_s29] sm:$0x1] %vm234_vm0, %v832_v0 }
  0x1a PF: > { %v290_v1 = vld [vmem:[%s901_s7 + $0x20] sm:$0xff]  ;;  %v288_v2 = vld [vmem:[%s901_s7 + $0x10] sm:$0xff]  ;;  %v833_v4 = vmov 0   ;;  %v291_v5 = vld [vmem:[%s901_s7 + $0x28] sm:$0xff]  ;;  %vm638_vm1 = vcmask 0  }
  0x1b   : > { %v286_v3 = vld [vmem:[%s901_s7] sm:$0xff]  ;;  %791 = vset.pattern.permute.xlu2 %v833_v4  ;;  %790 = vset.pattern.permute.xlu1 %v833_v4  ;;  %v289_v6 = vld [vmem:[%s901_s7 + $0x18] sm:$0xff]  ;;  %v287_v7 = vld [vmem:[%s901_s7 + $0x8] sm:$0xff] }
  0x1c   : > { %789 = vset.pattern.permute.xlu0 %v833_v4  ;;  %332 = vperm.xlu2 %791, %v290_v1   ;;  %v294_v8 = vld [vmem:[%s901_s7 + $0x40] sm:$0xff]  ;;  %v293_v9 = vld [vmem:[%s901_s7 + $0x38] sm:$0xff]  ;;  %v292_v10 = vld [vmem:[%s901_s7 + $0x30] sm:$0xff] }
  0x1d   : > { %322 = vperm.xlu1 %790, %v288_v2   ;;  %312 = vperm.xlu0 %789, %v286_v3   ;;  %v297_v11 = vld [vmem:[%s901_s7 + $0x58] sm:$0xff]  ;;  %v296_v12 = vld [vmem:[%s901_s7 + $0x50] sm:$0xff]  ;;  %v295_v13 = vld [vmem:[%s901_s7 + $0x48] sm:$0xff] }
  0x1e   : > { %v300_v14 = vld [vmem:[%s901_s7 + $0x70] sm:$0xff]  ;;  %v299_v15 = vld [vmem:[%s901_s7 + $0x68] sm:$0xff]  ;;  %v298_v16 = vld [vmem:[%s901_s7 + $0x60] sm:$0xff] }
  0x1f   : > { %v303_v17 = vld [vmem:[%s901_s7 + $0x88] sm:$0xff]  ;;  %v302_v18 = vld [vmem:[%s901_s7 + $0x80] sm:$0xff]  ;;  %v301_v19 = vld [vmem:[%s901_s7 + $0x78] sm:$0xff] }
  0x20   : > { %v306_v20 = vld [vmem:[%s901_s7 + $0xa0] sm:$0xff]  ;;  %v305_v21 = vld [vmem:[%s901_s7 + $0x98] sm:$0xff]  ;;  %v304_v22 = vld [vmem:[%s901_s7 + $0x90] sm:$0xff] }
  0x21   : > { %v309_v23 = vld [vmem:[%s901_s7 + $0xb8] sm:$0xff]  ;;  %v308_v24 = vld [vmem:[%s901_s7 + $0xb0] sm:$0xff]  ;;  %v307_v25 = vld [vmem:[%s901_s7 + $0xa8] sm:$0xff] }
  0x22   : > { %v284_v26 = vld [vmem:[%s891_s25] sm:$0x3]  ;;  %v237_v28 = vld [vmem:[%s906_s10 + $0x8] sm:$0xff]  ;;  %v238_v39 = vld [vmem:[%s906_s10 + $0x10] sm:$0xff] }
  0x23   : > { %v236_v27 = vld [vmem:[%s906_s10] sm:$0xff]  ;;  %v285_v29 = vsub.f32 1.0, %v284_v26  ;;  %v239_v40 = vld [vmem:[%s906_s10 + $0x18] sm:$0xff]  ;;  %v241_v41 = vld [vmem:[%s906_s10 + $0x28] sm:$0xff] }
  0x24   : > { %337 = vperm.xlu2 %791, %v291_v5   ;;  %v240_v36 = vld [vmem:[%s906_s10 + $0x20] sm:$0xff]  ;;  %v242_v50 = vld [vmem:[%s906_s10 + $0x30] sm:$0xff]  ;;  %v243_v53 = vld [vmem:[%s906_s10 + $0x38] sm:$0xff] }
  0x25   : > { %327 = vperm.xlu1 %790, %v289_v6   ;;  %317 = vperm.xlu0 %789, %v287_v7   ;;  %v937_v34 = vperm.slane %v285_v29, 0  ;;  %v939_v35 = vperm.slane %v285_v29, 1  ;;  %v244_v59 = vld [vmem:[%s906_s10 + $0x40] sm:$0xff]  ;;  %v245_v0 = vld [vmem:[%s906_s10 + $0x48] sm:$0xff]  ;;  %v246_v5 = vld [vmem:[%s906_s10 + $0x50] sm:$0xff] }
  0x2c   : > { %352 = vperm.xlu2 %791, %v294_v8  }
  0x2d   : > { %347 = vperm.xlu1 %790, %v293_v9   ;;  %342 = vperm.xlu0 %789, %v292_v10  }
  0x34   : > { %367 = vperm.xlu2 %791, %v297_v11   ;;  %v247_v11 = vld [vmem:[%s906_s10 + $0x58] sm:$0xff] }
  0x35   : > { %362 = vperm.xlu1 %790, %v296_v12   ;;  %357 = vperm.xlu0 %789, %v295_v13  }
  0x3c   : > { %382 = vperm.xlu2 %791, %v300_v14  }
  0x3d   : > { %377 = vperm.xlu1 %790, %v299_v15   ;;  %372 = vperm.xlu0 %789, %v298_v16  }
  0x44   : > { %397 = vperm.xlu2 %791, %v303_v17   ;;  %v248_v17 = vld [vmem:[%s906_s10 + $0x60] sm:$0xff] }
  0x45   : > { %392 = vperm.xlu1 %790, %v302_v18   ;;  %387 = vperm.xlu0 %789, %v301_v19  }
  0x4c   : > { %412 = vperm.xlu2 %791, %v306_v20  }
  0x4d   : > { %407 = vperm.xlu1 %790, %v305_v21   ;;  %402 = vperm.xlu0 %789, %v304_v22   ;;  %v249_v22 = vld [vmem:[%s906_s10 + $0x68] sm:$0xff] }
  0x54   : > { %427 = vperm.xlu2 %791, %v309_v23  }
  0x55   : > { %422 = vperm.xlu1 %790, %v308_v24   ;;  %417 = vperm.xlu0 %789, %v307_v25  }
  0x76   : > { %v333_v48 = vpop.permute.xlu2 %332 }
  0x77   : > { %v438_v1 = vsub.f32 %v244_v59, %v333_v48  ;;  %v439_v6 = vsub.f32 %v245_v0, %v333_v48 }
  0x79   : > { %v486_v12 = vand.u32 2147483647, %v438_v1  ;;  %v487_v18 = vand.u32 2147483647, %v439_v6 }
  0x7b   : > { %v539_v23 = vmul.f32 %v937_v34, %v486_v12  ;;  %v540_v29 = vmul.f32 %v939_v35, %v487_v18 }
  0x7e   : > { %v338_v10 = vpop.permute.xlu2 %337 }
  0x7f   : > { %v440_v13 = vsub.f32 %v246_v5, %v338_v10  ;;  %v441_v19 = vsub.f32 %v247_v11, %v338_v10 }
  0x81   : > { %v488_v24 = vand.u32 2147483647, %v440_v13 }
  0x8f   : > { %v323_v30 = vpop.permute.xlu1 %322  ;;  %v313_v31 = vpop.permute.xlu0 %312 }
  0x90   : > { %v430_v32 = vsub.f32 %v236_v27, %v313_v31  ;;  %v431_v33 = vsub.f32 %v237_v28, %v313_v31  ;;  %v434_v42 = vsub.f32 %v240_v36, %v323_v30  ;;  %v435_v51 = vsub.f32 %v241_v41, %v323_v30  ;;  %v250_v28 = vld [vmem:[%s906_s10 + $0x70] sm:$0xff] }
  0x91   : > { %v489_v30 = vand.u32 2147483647, %v441_v19  ;;  %v541_v36 = vmul.f32 %v937_v34, %v488_v24 }
  0x92   : > { %v478_v37 = vand.u32 2147483647, %v430_v32  ;;  %v479_v38 = vand.u32 2147483647, %v431_v33  ;;  %v482_v55 = vand.u32 2147483647, %v434_v42 }
  0x93   : > { %v483_v60 = vand.u32 2147483647, %v435_v51  ;;  %v251_v33 = vld [vmem:[%s906_s10 + $0x78] sm:$0xff]  ;;  %v542_v41 = vmul.f32 %v939_v35, %v489_v30 }
  0x94   : > { %v531_v44 = vmul.f32 %v937_v34, %v478_v37  ;;  %v532_v45 = vmul.f32 %v939_v35, %v479_v38  ;;  %v535_v2 = vmul.f32 %v937_v34, %v482_v55 }
  0x95   : > { %v536_v7 = vmul.f32 %v939_v35, %v483_v60 }
  0x96   : > { %v580_v56 = vadd.f32 %v532_v45, %v531_v44  ;;  %v353_v45 = vpop.permute.xlu2 %352 }
  0x97   : > { %v318_v43 = vpop.permute.xlu0 %317  ;;  %v328_v49 = vpop.permute.xlu1 %327 }
  0x98   : > { %v432_v46 = vsub.f32 %v238_v39, %v318_v43  ;;  %v433_v47 = vsub.f32 %v239_v40, %v318_v43  ;;  %v436_v57 = vsub.f32 %v242_v50, %v328_v49  ;;  %v437_v61 = vsub.f32 %v243_v53, %v328_v49  ;;  %v252_v40 = vld [vmem:[%s906_s10 + $0x80] sm:$0xff] }
  0x9a   : > { %v480_v52 = vand.u32 2147483647, %v432_v46  ;;  %v481_v54 = vand.u32 2147483647, %v433_v47  ;;  %v484_v3 = vand.u32 2147483647, %v436_v57  ;;  %v446_v47 = vsub.f32 %v252_v40, %v353_v45 }
  0x9b   : > { %v485_v8 = vand.u32 2147483647, %v437_v61  ;;  %v253_v46 = vld [vmem:[%s906_s10 + $0x88] sm:$0xff]  ;;  %v255_v57 = vld [vmem:[%s906_s10 + $0x98] sm:$0xff] }
  0x9c   : > { %v533_v58 = vmul.f32 %v937_v34, %v480_v52  ;;  %v534_v62 = vmul.f32 %v939_v35, %v481_v54  ;;  %v537_v14 = vmul.f32 %v937_v34, %v484_v3  ;;  %v254_v52 = vld [vmem:[%s906_s10 + $0x90] sm:$0xff]  ;;  %v447_v53 = vsub.f32 %v253_v46, %v353_v45 }
  0x9d   : > { %v538_v20 = vmul.f32 %v939_v35, %v485_v8 }
  0x9e   : > { %v581_v63 = vadd.f32 %v580_v56, %v533_v58  ;;  %v494_v58 = vand.u32 2147483647, %v446_v47  ;;  %v495_v0 = vand.u32 2147483647, %v447_v53 }
  0x9f   : > { %v343_v16 = vpop.permute.xlu0 %342  ;;  %v348_v27 = vpop.permute.xlu1 %347 }
  0xa0   : > { %v582_v4 = vadd.f32 %v581_v63, %v534_v62  ;;  %v442_v26 = vsub.f32 %v248_v17, %v343_v16  ;;  %v443_v31 = vsub.f32 %v249_v22, %v343_v16  ;;  %v444_v37 = vsub.f32 %v250_v28, %v348_v27  ;;  %v256_v63 = vld [vmem:[%s906_s10 + $0xa0] sm:$0xff] }
  0xa1   : > { %v445_v42 = vsub.f32 %v251_v33, %v348_v27  ;;  %v547_v5 = vmul.f32 %v937_v34, %v494_v58  ;;  %v548_v10 = vmul.f32 %v939_v35, %v495_v0 }
  0xa2   : > { %v583_v9 = vadd.f32 %v582_v4, %v535_v2  ;;  %v490_v38 = vand.u32 2147483647, %v442_v26  ;;  %v491_v43 = vand.u32 2147483647, %v443_v31  ;;  %v492_v48 = vand.u32 2147483647, %v444_v37 }
  0xa3   : > { %v493_v54 = vand.u32 2147483647, %v445_v42  ;;  %v257_v4 = vld [vmem:[%s906_s10 + $0xa8] sm:$0xff] }
  0xa4   : > { %v584_v15 = vadd.f32 %v583_v9, %v536_v7  ;;  %v543_v49 = vmul.f32 %v937_v34, %v490_v38  ;;  %v544_v55 = vmul.f32 %v939_v35, %v491_v43  ;;  %v545_v59 = vmul.f32 %v937_v34, %v492_v48  ;;  %v258_v9 = vld [vmem:[%s906_s10 + $0xb0] sm:$0xff]  ;;  %v261_v26 = vld [vmem:[%s906_s10 + $0xc8] sm:$0xff] }
  0xa5   : > { %v546_v1 = vmul.f32 %v939_v35, %v493_v54 }
  0xa6   : > { %v585_v21 = vadd.f32 %v584_v15, %v537_v14  ;;  %v368_v14 = vpop.permute.xlu2 %367  ;;  %v259_v15 = vld [vmem:[%s906_s10 + $0xb8] sm:$0xff] }
  0xa7   : > { %v358_v51 = vpop.permute.xlu0 %357  ;;  %v363_v62 = vpop.permute.xlu1 %362  ;;  %v452_v16 = vsub.f32 %v258_v9, %v368_v14  ;;  %v453_v22 = vsub.f32 %v259_v15, %v368_v14  ;;  %v270_v14 = vld [vmem:[%s906_s10 + $0x110] sm:$0xff] }
  0xa8   : > { %v586_v25 = vadd.f32 %v585_v21, %v538_v20  ;;  %v448_v61 = vsub.f32 %v254_v52, %v358_v51  ;;  %v449_v3 = vsub.f32 %v255_v57, %v358_v51  ;;  %v450_v7 = vsub.f32 %v256_v63, %v363_v62  ;;  %v260_v21 = vld [vmem:[%s906_s10 + $0xc0] sm:$0xff] }
  0xa9   : > { %v451_v11 = vsub.f32 %v257_v4, %v363_v62  ;;  %v500_v27 = vand.u32 2147483647, %v452_v16  ;;  %v501_v33 = vand.u32 2147483647, %v453_v22 }
  0xaa   : > { %v587_v32 = vadd.f32 %v586_v25, %v539_v23  ;;  %v496_v8 = vand.u32 2147483647, %v448_v61  ;;  %v497_v12 = vand.u32 2147483647, %v449_v3  ;;  %v498_v17 = vand.u32 2147483647, %v450_v7 }
  0xab   : > { %v499_v23 = vand.u32 2147483647, %v451_v11  ;;  %v553_v40 = vmul.f32 %v937_v34, %v500_v27  ;;  %v554_v45 = vmul.f32 %v939_v35, %v501_v33  ;;  %v267_v61 = vld [vmem:[%s906_s10 + $0xf8] sm:$0xff]  ;;  %v268_v3 = vld [vmem:[%s906_s10 + $0x100] sm:$0xff] }
  0xac   : > { %v588_v39 = vadd.f32 %v587_v32, %v540_v29  ;;  %v549_v18 = vmul.f32 %v937_v34, %v496_v8  ;;  %v550_v24 = vmul.f32 %v939_v35, %v497_v12  ;;  %v551_v28 = vmul.f32 %v937_v34, %v498_v17  ;;  %v262_v32 = vld [vmem:[%s906_s10 + $0xd0] sm:$0xff]  ;;  %v269_v8 = vld [vmem:[%s906_s10 + $0x108] sm:$0xff] }
  0xae   : > { %v589_v44 = vadd.f32 %v588_v39, %v541_v36  ;;  %v552_v36 = vmul.f32 %v939_v35, %v499_v23  ;;  %v263_v39 = vld [vmem:[%s906_s10 + $0xd8] sm:$0xff] }
  0xaf   : > { %v373_v20 = vpop.permute.xlu0 %372  ;;  %v378_v31 = vpop.permute.xlu1 %377 }
  0xb0   : > { %v590_v50 = vadd.f32 %v589_v44, %v542_v41  ;;  %v454_v30 = vsub.f32 %v260_v21, %v373_v20  ;;  %v455_v38 = vsub.f32 %v261_v26, %v373_v20  ;;  %v456_v42 = vsub.f32 %v262_v32, %v378_v31  ;;  %v264_v44 = vld [vmem:[%s906_s10 + $0xe0] sm:$0xff] }
  0xb1   : > { %v457_v46 = vsub.f32 %v263_v39, %v378_v31 }
  0xb2   : > { %v591_v56 = vadd.f32 %v590_v50, %v543_v49  ;;  %v502_v43 = vand.u32 2147483647, %v454_v30  ;;  %v503_v47 = vand.u32 2147483647, %v455_v38  ;;  %v383_v49 = vpop.permute.xlu2 %382  ;;  %v265_v50 = vld [vmem:[%s906_s10 + $0xe8] sm:$0xff]  ;;  %v274_v38 = vld [vmem:[%s906_s10 + $0x130] sm:$0xff] }
  0xb3   : > { %v458_v51 = vsub.f32 %v264_v44, %v383_v49  ;;  %v504_v52 = vand.u32 2147483647, %v456_v42  ;;  %v459_v57 = vsub.f32 %v265_v50, %v383_v49  ;;  %v505_v58 = vand.u32 2147483647, %v457_v46  ;;  %v273_v30 = vld [vmem:[%s906_s10 + $0x128] sm:$0xff]  ;;  %v276_v49 = vld [vmem:[%s906_s10 + $0x140] sm:$0xff] }
  0xb4   : > { %v592_v60 = vadd.f32 %v591_v56, %v544_v55  ;;  %v555_v53 = vmul.f32 %v937_v34, %v502_v43  ;;  %v266_v56 = vld [vmem:[%s906_s10 + $0xf0] sm:$0xff]  ;;  %v275_v43 = vld [vmem:[%s906_s10 + $0x138] sm:$0xff] }
  0xb5   : > { %v506_v62 = vand.u32 2147483647, %v458_v51  ;;  %v557_v63 = vmul.f32 %v937_v34, %v504_v52  ;;  %v507_v4 = vand.u32 2147483647, %v459_v57 }
  0xb6   : > { %v593_v2 = vadd.f32 %v592_v60, %v545_v59  ;;  %v556_v59 = vmul.f32 %v939_v35, %v503_v47 }
  0xb7   : > { %v388_v55 = vpop.permute.xlu0 %387  ;;  %v559_v9 = vmul.f32 %v937_v34, %v506_v62  ;;  %v560_v15 = vmul.f32 %v939_v35, %v507_v4 }
  0xb8   : > { %v594_v6 = vadd.f32 %v593_v2, %v546_v1  ;;  %v460_v1 = vsub.f32 %v266_v56, %v388_v55  ;;  %v393_v2 = vpop.permute.xlu1 %392  ;;  %v461_v7 = vsub.f32 %v267_v61, %v388_v55 }
  0xb9   : > { %v462_v11 = vsub.f32 %v268_v3, %v393_v2  ;;  %v463_v16 = vsub.f32 %v269_v8, %v393_v2 }
  0xba   : > { %v595_v13 = vadd.f32 %v594_v6, %v547_v5  ;;  %v558_v5 = vmul.f32 %v939_v35, %v505_v58  ;;  %v508_v12 = vand.u32 2147483647, %v460_v1  ;;  %v509_v17 = vand.u32 2147483647, %v461_v7  ;;  %v279_v1 = vld [vmem:[%s906_s10 + $0x158] sm:$0xff]  ;;  %v280_v7 = vld [vmem:[%s906_s10 + $0x160] sm:$0xff] }
  0xbb   : > { %v510_v21 = vand.u32 2147483647, %v462_v11  ;;  %v511_v27 = vand.u32 2147483647, %v463_v16 }
  0xbc   : > { %v596_v19 = vadd.f32 %v595_v13, %v548_v10  ;;  %v398_v13 = vpop.permute.xlu2 %397  ;;  %v561_v22 = vmul.f32 %v937_v34, %v508_v12  ;;  %v281_v12 = vld [vmem:[%s906_s10 + $0x168] sm:$0xff] }
  0xbd   : > { %v464_v20 = vsub.f32 %v270_v14, %v398_v13  ;;  %v563_v32 = vmul.f32 %v937_v34, %v510_v21 }
  0xbe   : > { %v597_v25 = vadd.f32 %v596_v19, %v549_v18  ;;  %v271_v19 = vld [vmem:[%s906_s10 + $0x118] sm:$0xff] }
  0xbf   : > { %v465_v26 = vsub.f32 %v271_v19, %v398_v13  ;;  %v512_v31 = vand.u32 2147483647, %v464_v20 }
  0xc0   : > { %v598_v29 = vadd.f32 %v597_v25, %v550_v24  ;;  %v403_v24 = vpop.permute.xlu0 %402  ;;  %v272_v25 = vld [vmem:[%s906_s10 + $0x120] sm:$0xff] }
  0xc1   : > { %v513_v39 = vand.u32 2147483647, %v465_v26  ;;  %v467_v42 = vsub.f32 %v273_v30, %v403_v24  ;;  %v565_v44 = vmul.f32 %v937_v34, %v512_v31 }
  0xc2   : > { %v599_v37 = vadd.f32 %v598_v29, %v551_v28  ;;  %v562_v28 = vmul.f32 %v939_v35, %v509_v17 }
  0xc3   : > { %v566_v50 = vmul.f32 %v939_v35, %v513_v39  ;;  %v515_v52 = vand.u32 2147483647, %v467_v42 }
  0xc4   : > { %v600_v41 = vadd.f32 %v599_v37, %v552_v36  ;;  %v466_v36 = vsub.f32 %v272_v25, %v403_v24  ;;  %v408_v37 = vpop.permute.xlu1 %407 }
  0xc5   : > { %v468_v46 = vsub.f32 %v274_v38, %v408_v37  ;;  %v469_v51 = vsub.f32 %v275_v43, %v408_v37 }
  0xc6   : > { %v601_v48 = vadd.f32 %v600_v41, %v553_v40  ;;  %v564_v40 = vmul.f32 %v939_v35, %v511_v27  ;;  %v514_v47 = vand.u32 2147483647, %v466_v36 }
  0xc7   : > { %v516_v56 = vand.u32 2147483647, %v468_v46  ;;  %v517_v62 = vand.u32 2147483647, %v469_v51 }
  0xc8   : > { %v602_v54 = vadd.f32 %v601_v48, %v554_v45  ;;  %v413_v48 = vpop.permute.xlu2 %412  ;;  %v567_v57 = vmul.f32 %v937_v34, %v514_v47 }
  0xc9   : > { %v470_v55 = vsub.f32 %v276_v49, %v413_v48  ;;  %v569_v3 = vmul.f32 %v937_v34, %v516_v56 }
  0xca   : > { %v603_v60 = vadd.f32 %v602_v54, %v555_v53  ;;  %v277_v54 = vld [vmem:[%s906_s10 + $0x148] sm:$0xff] }
  0xcb   : > { %v471_v61 = vsub.f32 %v277_v54, %v413_v48  ;;  %v518_v2 = vand.u32 2147483647, %v470_v55 }
  0xcc   : > { %v604_v0 = vadd.f32 %v603_v60, %v556_v59  ;;  %v418_v59 = vpop.permute.xlu0 %417  ;;  %v278_v60 = vld [vmem:[%s906_s10 + $0x150] sm:$0xff] }
  0xcd   : > { %v519_v8 = vand.u32 2147483647, %v471_v61  ;;  %v473_v11 = vsub.f32 %v279_v1, %v418_v59  ;;  %v571_v13 = vmul.f32 %v937_v34, %v518_v2 }
  0xce   : > { %v605_v6 = vadd.f32 %v604_v0, %v557_v63  ;;  %v568_v63 = vmul.f32 %v939_v35, %v515_v52  ;;  %v579_v52 = vld [vmem:[%s896_s29] sm:$0x1] }
  0xcf   : > { %v572_v19 = vmul.f32 %v939_v35, %v519_v8  ;;  %v521_v21 = vand.u32 2147483647, %v473_v11 }
  0xd0   : > { %v606_v10 = vadd.f32 %v605_v6, %v558_v5  ;;  %v472_v5 = vsub.f32 %v278_v60, %v418_v59  ;;  %v423_v6 = vpop.permute.xlu1 %422  ;;  %v428_v17 = vpop.permute.xlu2 %427 }
  0xd1   : > { %v475_v20 = vsub.f32 %v281_v12, %v423_v6  ;;  %v574_v30 = vmul.f32 %v939_v35, %v521_v21 }
  0xd2   : > { %v607_v18 = vadd.f32 %v606_v10, %v559_v9  ;;  %v570_v9 = vmul.f32 %v939_v35, %v517_v62  ;;  %v520_v16 = vand.u32 2147483647, %v472_v5 }
  0xd4   : > { %v608_v23 = vadd.f32 %v607_v18, %v560_v15  ;;  %v474_v15 = vsub.f32 %v280_v7, %v423_v6  ;;  %v282_v18 = vld [vmem:[%s906_s10 + $0x170] sm:$0xff]  ;;  %v573_v26 = vmul.f32 %v937_v34, %v520_v16 }
  0xd5   : > { %v476_v24 = vsub.f32 %v282_v18, %v428_v17 }
  0xd6   : > { %v609_v29 = vadd.f32 %v608_v23, %v561_v22  ;;  %v283_v23 = vld [vmem:[%s906_s10 + $0x178] sm:$0xff]  ;;  %v522_v25 = vand.u32 2147483647, %v474_v15 }
  0xd8   : > { %v610_v33 = vadd.f32 %v609_v29, %v562_v28  ;;  %v477_v28 = vsub.f32 %v283_v23, %v428_v17  ;;  %v523_v29 = vand.u32 2147483647, %v475_v20 }
  0xda   : > { %v611_v41 = vadd.f32 %v610_v33, %v563_v32  ;;  %v524_v32 = vand.u32 2147483647, %v476_v24  ;;  %v575_v33 = vmul.f32 %v937_v34, %v522_v25  ;;  %v525_v37 = vand.u32 2147483647, %v477_v28 }
  0xdb   : > { %v576_v38 = vmul.f32 %v939_v35, %v523_v29 }
  0xdc   : > { %v612_v45 = vadd.f32 %v611_v41, %v564_v40  ;;  %v577_v40 = vmul.f32 %v937_v34, %v524_v32  ;;  %v578_v42 = vmul.f32 %v939_v35, %v525_v37 }
  0xde   : > { %v613_v53 = vadd.f32 %v612_v45, %v565_v44 }
  0xe0   : > { %v614_v58 = vadd.f32 %v613_v53, %v566_v50 }
  0xe2   : > { %v615_v0 = vadd.f32 %v614_v58, %v567_v57 }
  0xe4   : > { %v616_v4 = vadd.f32 %v615_v0, %v568_v63 }
  0xe6   : > { %v617_v10 = vadd.f32 %v616_v4, %v569_v3 }
  0xe8   : > { %v618_v14 = vadd.f32 %v617_v10, %v570_v9 }
  0xea   : > { %v619_v22 = vadd.f32 %v618_v14, %v571_v13 }
  0xec   : > { %v620_v27 = vadd.f32 %v619_v22, %v572_v19 }
  0xee   : > { %v621_v31 = vadd.f32 %v620_v27, %v573_v26 }
  0xf0   : > { %v622_v36 = vadd.f32 %v621_v31, %v574_v30 }
  0xf2   : > { %v623_v39 = vadd.f32 %v622_v36, %v575_v33 }
  0xf4   : > { %v624_v41 = vadd.f32 %v623_v39, %v576_v38 }
  0xf6   : > { %v625_v43 = vadd.f32 %v624_v41, %v577_v40 }
  0xf8   : > { %v626_v44 = vadd.f32 %v625_v43, %v578_v42 }
  0xfa   : > { %627 = vadd.xlane.f32.xlu0 %v626_v44 }
 0x16d   : > { %v628_v45 = vpop.xlane.xlu0 %627 }
 0x16e   : > { %v629_v46 = vrot.slane %v628_v45, 4 }
 0x170   : > { %v630_v47 = vadd.f32 %v629_v46, %v628_v45 }
 0x172   : > { %v631_v48 = vrot.slane %v630_v47, 2 }
 0x174   : > { %v632_v49 = vadd.f32 %v631_v48, %v630_v47 }
 0x176   : > { %v633_v50 = vrot.slane %v632_v49, 1 }
 0x178   : > { %v634_v51 = vadd.f32 %v633_v50, %v632_v49 }
 0x17a   : > { %745 = vpush %v634_v51 }
 0x1ab   : > { %s746_s11 = spop %745 }
 0x1ac   : > { %v636_v53 = vstv %s746_s11 }
 0x1ad   : > { %v637_v34 = vadd.f32 %v636_v53, %v579_v52 }
 0x1af   : > { %639 = vst.msk [vmem:[%s896_s29] sm:$0x1] %vm638_vm1, %v637_v34 }
 0x1b0 PF: > { %s13_s16 = sadd.s32 1, %s830_s16   ;;  %s1056_s12 = smov %s822_s14 }
 0x1b1   : > { %p10_p8 = scmp.ge.s32.totalorder %s13_s16, 8   ;;  %s1057_s13 = smov %s826_s15 }
 0x1b2   : > { %s1058_s14 = smov %s1061_s17  ;;  %s1059_s15 = smov %s1065_s18 }
 0x1b3   :  { %12 = sbr.rel (!%p10_p8) target bundleno = 3 (0x3), region = 72 }

</bundles_post_ra>
